<compile_context>
chip_gen: v7x
topology: tpu7x:2x2x1
jax: 0.10.0
libtpu: 0.0.40
codegen_flags: <defaults>
</compile_context>

<pallas_src>
import jax
import jax.numpy as jnp
from jax.experimental import pallas as pl
from jax.experimental.pallas import tpu as pltpu

T = 600            # sequence length baked into the module
MAX_ROW_TILE = 512  # rows per grid step cap; ~1.2 MB f32 block, well under VMEM limits


def _ce_kernel(d_ref, desc_ref, out_ref):
    """Per-tile partial sum of  w(t) * softplus(d(t))  over the row tile."""
    d_raw = d_ref[...]                       # (R, T) f32  signed logit gap z_other - z_true
    desc = desc_ref[...]                     # (R, 9) f32  [a0,b0,a1,b1,a2,b2, w0,w1,w2]
    bounds = desc[:, :6].astype(jnp.int32)   # tiny cast; bounds <= 600 are exact in f32

    pos = jax.lax.broadcasted_iota(jnp.int32, d_raw.shape, 1)

    # Per-position mean-CE weights, rebuilt in-kernel from up to 3 half-open ranges
    # per row, each weighted by 1/len.
    w = jnp.zeros_like(d_raw)
    for k in range(3):
        lo = bounds[:, 2 * k:2 * k + 1]          # (R, 1)
        hi = bounds[:, 2 * k + 1:2 * k + 2]      # (R, 1)
        wk = desc[:, 6 + k:7 + k]                # (R, 1)
        w = w + jnp.where((pos >= lo) & (pos < hi), wk, 0.0)

    # NaN safety: the last (partial) tile reads unspecified rows of d, but those rows
    # have all-zero (padded) descriptors => w == 0, and this select zeroes d BEFORE
    # any transcendental / multiply, so garbage can never reach the sum.
    d = jnp.where(w > 0.0, d_raw, 0.0)

    # Stable 2-class CE: CE = logsumexp(z0, z1) - z_true = softplus(z_other - z_true).
    # log(1 + x) with x = exp(-|d|) in (0, 1] has no cancellation; the only loss vs
    # log1p is the sub-f32-epsilon tail for |d| > ~16, negligible after 1/len
    # weighting (and jnp.log has a guaranteed Mosaic lowering).
    ce = jnp.maximum(d, 0.0) + jnp.log(1.0 + jnp.exp(-jnp.abs(d)))

    total = jnp.sum(ce * w, keepdims=True)       # (1, 1)
    out_ref[...] = jnp.broadcast_to(total, out_ref.shape)


def _row_segments(y_row):
    """Segment descriptor replicating the reference's per-sample slice arithmetic.

    Returns a (9,) f32 row: [a0, b0, a1, b1, a2, b2, 1/len0, 1/len1, 1/len2] with
    bounds normalised to half-open ranges in [0, T] (Python-slice negative wrap +
    clip) and 1/len == 0 for empty segments.
    """
    delta = y_row[1:] - y_row[:-1]
    has_s = jnp.any(delta == 1)
    s = jnp.where(has_s, jnp.argmax(delta == 1) + 1, 0).astype(jnp.int32)
    has_e = jnp.any(delta == -1)
    e = jnp.where(has_e, jnp.argmax(delta == -1) + 1, T).astype(jnp.int32)

    sz1 = jnp.minimum(s + 30, e - 10)
    szend1 = jnp.maximum(s + 30 + 10, e - 30)
    len1 = szend1 - sz1
    cond_if = len1 < s

    e1 = jnp.maximum(1, s - 30)
    rem = len1 - e1
    s2 = jnp.minimum(599, szend1 + 30)
    e2 = jnp.minimum(600, s2 + rem)

    # seg0: always; seg1: [0,len1) (if-branch) or [0,e1) (else); seg2: else-branch only.
    a = jnp.stack([sz1, jnp.int32(0), jnp.where(cond_if, 0, s2)])
    b = jnp.stack([szend1, jnp.where(cond_if, len1, e1), jnp.where(cond_if, 0, e2)])

    # Python-slice normalisation (negative wrap + clip to [0, T]), then 1/len weights.
    a_eff = jnp.clip(jnp.where(a < 0, a + T, a), 0, T)
    b_eff = jnp.clip(jnp.where(b < 0, b + T, b), 0, T)
    length = jnp.maximum(b_eff - a_eff, 0)
    # TODO(synk): PyTorch CrossEntropyLoss returns NaN for an empty slice (impossible
    # for well-formed binary labels); empty segments contribute 0 here instead.
    invw = jnp.where(length > 0,
                     1.0 / jnp.maximum(length, 1).astype(jnp.float32), 0.0)

    bounds = jnp.stack([a_eff[0], b_eff[0], a_eff[1], b_eff[1],
                        a_eff[2], b_eff[2]]).astype(jnp.float32)
    return jnp.concatenate([bounds, invw.astype(jnp.float32)])


def _choose_row_tile(n):
    """Largest row tile (<= MAX_ROW_TILE, multiple of 8) still giving >= 2 grid steps,
    so the 'parallel' grid axis can split across v7x's two TensorCores; very small
    batches fall back to a single 8-row tile."""
    if n <= 8:
        return 8
    half = -(-n // 2)                 # ceil(n / 2)
    half = -(-half // 8) * 8          # round up to a sublane multiple
    return max(8, min(MAX_ROW_TILE, half))


@jax.jit
def clean_cel(ypred, y):
    ypred = ypred.reshape(-1, T, 2).astype(jnp.float32)
    y = y.reshape(-1, T).astype(jnp.int32)
    n = y.shape[0]

    # Per-row segment descriptors (tiny: 9 numbers per sample), merged into one array.
    desc = jax.vmap(_row_segments)(y)                       # (n, 9) f32

    # Signed logit gap d = z_other - z_true, computed in ONE fused XLA pass so the
    # kernel's dominant HBM stream is a single (n, 600) f32 array and labels never
    # travel to the kernel. Assumes labels in {0, 1}, same as nn.CrossEntropyLoss.
    diff = ypred[..., 1] - ypred[..., 0]
    d = jnp.where(y > 0, -diff, diff)

    row_tile = _choose_row_tile(n)
    g = pl.cdiv(n, row_tile)

    # Pad only the tiny descriptor array so OOB tail rows see zero-length segments
    # (w == 0 everywhere); the big gap array stays unpadded (kernel masks via w > 0).
    pad = g * row_tile - n
    if pad:
        desc = jnp.pad(desc, ((0, pad), (0, 0)))

    cost = pl.CostEstimate(
        flops=25 * n * T,
        transcendentals=2 * n * T,
        bytes_accessed=n * T * 4 + g * row_tile * 9 * 4 + g * 8 * 128 * 4,
    )

    partial_sums = pl.pallas_call(
        _ce_kernel,
        out_shape=jax.ShapeDtypeStruct((g * 8, 128), jnp.float32),
        grid=(g,),
        in_specs=[
            pl.BlockSpec((row_tile, T), lambda i: (i, 0)),   # signed logit gap
            pl.BlockSpec((row_tile, 9), lambda i: (i, 0)),   # merged segment descriptors
        ],
        out_specs=pl.BlockSpec((8, 128), lambda i: (i, 0)),
        compiler_params=pltpu.CompilerParams(
            dimension_semantics=("parallel",),
            vmem_limit_bytes=32 * 1024 * 1024,
        ),
        cost_estimate=cost,
    )(d, desc)

    # One (splatted) partial sum per row tile; reduce + normalise in JAX.
    tile_sums = partial_sums.reshape(g, 8, 128)[:, 0, 0]
    return jnp.sum(tile_sums) / n


# ---------------------------------------------------------------------------
# Pure-JAX reference (same math as the PyTorch module, weight formulation).
# ---------------------------------------------------------------------------
def _slice_weight(a, b):
    a_eff = jnp.clip(jnp.where(a < 0, a + T, a), 0, T)
    b_eff = jnp.clip(jnp.where(b < 0, b + T, b), 0, T)
    length = jnp.maximum(b_eff - a_eff, 0)
    idx = jnp.arange(T)
    mask = (idx >= a_eff) & (idx < b_eff)
    return mask.astype(jnp.float32) / jnp.maximum(length, 1).astype(jnp.float32)


def _segment_weights_ref(y_row):
    delta = y_row[1:] - y_row[:-1]
    has_s = jnp.any(delta == 1)
    s = jnp.where(has_s, jnp.argmax(delta == 1) + 1, 0).astype(jnp.int32)
    has_e = jnp.any(delta == -1)
    e = jnp.where(has_e, jnp.argmax(delta == -1) + 1, T).astype(jnp.int32)

    sz1 = jnp.minimum(s + 30, e - 10)
    szend1 = jnp.maximum(s + 30 + 10, e - 30)
    len1 = szend1 - sz1

    w = _slice_weight(sz1, szend1)
    w_if = _slice_weight(0, len1)
    e1 = jnp.maximum(1, s - 30)
    rem = len1 - e1
    s2 = jnp.minimum(599, szend1 + 30)
    e2 = jnp.minimum(600, s2 + rem)
    w_else = _slice_weight(0, e1) + _slice_weight(s2, e2)
    return w + jnp.where(len1 < s, w_if, w_else)


def _reference_loss(ypred, y):
    ypred = ypred.reshape(-1, T, 2).astype(jnp.float32)
    y = y.reshape(-1, T).astype(jnp.int32)
    w = jax.vmap(_segment_weights_ref)(y)
    z0, z1 = ypred[..., 0], ypred[..., 1]
    m = jnp.maximum(z0, z1)
    lse = m + jnp.log(jnp.exp(z0 - m) + jnp.exp(z1 - m))
    z_true = jnp.where(y > 0, z1, z0)
    return jnp.sum((lse - z_true) * w) / y.shape[0]


if __name__ == "__main__":
    key = jax.random.PRNGKey(0)
    n = 3

    # Logits (N, 600, 2)
    ypred = jax.random.normal(key, (n, T, 2), dtype=jnp.float32)

    # Binary label traces: two with a "seizure" window (one hits the if-branch of the
    # reference, one the else-branch) and one all-zero trace (s=0, e=600 fallback).
    t_idx = jnp.arange(T)
    y0 = ((t_idx >= 100) & (t_idx < 400)).astype(jnp.int32)   # s=100, e=400  -> else
    y1 = ((t_idx >= 200) & (t_idx < 350)).astype(jnp.int32)   # s=200, e=350  -> if
    y2 = jnp.zeros((T,), jnp.int32)                           # no window     -> else
    y = jnp.stack([y0, y1, y2], axis=0)

    loss = jax.block_until_ready(clean_cel(ypred, y))
    ref = jax.block_until_ready(_reference_loss(ypred, y))

    assert jnp.isfinite(loss), f"loss not finite: {loss}"
    assert jnp.allclose(loss, ref, rtol=1e-4, atol=1e-5), (loss, ref)
    print("KERNEL_OK")
</pallas_src>

<mosaic_0001>
module attributes {stable_mosaic.version = 11 : i64} {
  func.func @_ce_kernel(%arg0: i32, %arg1: memref<8x600xf32, #tpu.memory_space<vmem>>, %arg2: memref<8x9xf32, #tpu.memory_space<vmem>>, %arg3: memref<8x128xf32, #tpu.memory_space<vmem>>) attributes {dimension_semantics = [#tpu.dimension_semantics<parallel>], iteration_bounds = array<i64: 1>, scalar_prefetch = 0 : i64, scratch_operands = 0 : i64, tpu.core_type = #tpu.core_type<tc>, window_params = [{transform_indices = @transform_0, window_bounds = array<i64: 8, 600>}, {transform_indices = @transform_1, window_bounds = array<i64: 8, 9>}, {transform_indices = @transform_2, window_bounds = array<i64: 8, 128>}]} {
    %c0 = arith.constant 0 : index
    %c0_0 = arith.constant 0 : index
    %0 = vector.load %arg1[%c0, %c0_0] : memref<8x600xf32, #tpu.memory_space<vmem>>, vector<8x600xf32>
    %c0_1 = arith.constant 0 : index
    %c0_2 = arith.constant 0 : index
    %1 = vector.load %arg2[%c0_1, %c0_2] : memref<8x9xf32, #tpu.memory_space<vmem>>, vector<8x9xf32>
    %2 = vector.extract_strided_slice %1 {offsets = [0, 0], sizes = [8, 6], strides = [1, 1]} : vector<8x9xf32> to vector<8x6xf32>
    %3 = arith.fptosi %2 : vector<8x6xf32> to vector<8x6xi32>
    %4 = tpu.iota {dimensions = array<i32: 1>} : vector<8x600xi32>
    %cst = arith.constant 0.000000e+00 : f32
    %5 = vector.broadcast %cst : f32 to vector<8x600xf32>
    %6 = vector.extract_strided_slice %3 {offsets = [0, 0], sizes = [8, 1], strides = [1, 1]} : vector<8x6xi32> to vector<8x1xi32>
    %7 = vector.extract_strided_slice %3 {offsets = [0, 1], sizes = [8, 1], strides = [1, 1]} : vector<8x6xi32> to vector<8x1xi32>
    %8 = vector.extract_strided_slice %1 {offsets = [0, 6], sizes = [8, 1], strides = [1, 1]} : vector<8x9xf32> to vector<8x1xf32>
    %9 = vector.broadcast %6 : vector<8x1xi32> to vector<8x600xi32>
    %10 = arith.cmpi sge, %4, %9 : vector<8x600xi32>
    %11 = vector.broadcast %7 : vector<8x1xi32> to vector<8x600xi32>
    %12 = arith.cmpi slt, %4, %11 : vector<8x600xi32>
    %13 = arith.andi %10, %12 : vector<8x600xi1>
    %cst_3 = arith.constant 0.000000e+00 : f32
    %14 = vector.shape_cast %8 : vector<8x1xf32> to vector<8x1xf32>
    %15 = vector.broadcast %14 : vector<8x1xf32> to vector<8x600xf32>
    %16 = vector.broadcast %cst_3 : f32 to vector<8x600xf32>
    %17 = arith.select %13, %15, %16 : vector<8x600xi1>, vector<8x600xf32>
    %18 = arith.addf %5, %17 : vector<8x600xf32>
    %19 = vector.extract_strided_slice %3 {offsets = [0, 2], sizes = [8, 1], strides = [1, 1]} : vector<8x6xi32> to vector<8x1xi32>
    %20 = vector.extract_strided_slice %3 {offsets = [0, 3], sizes = [8, 1], strides = [1, 1]} : vector<8x6xi32> to vector<8x1xi32>
    %21 = vector.extract_strided_slice %1 {offsets = [0, 7], sizes = [8, 1], strides = [1, 1]} : vector<8x9xf32> to vector<8x1xf32>
    %22 = vector.broadcast %19 : vector<8x1xi32> to vector<8x600xi32>
    %23 = arith.cmpi sge, %4, %22 : vector<8x600xi32>
    %24 = vector.broadcast %20 : vector<8x1xi32> to vector<8x600xi32>
    %25 = arith.cmpi slt, %4, %24 : vector<8x600xi32>
    %26 = arith.andi %23, %25 : vector<8x600xi1>
    %cst_4 = arith.constant 0.000000e+00 : f32
    %27 = vector.shape_cast %21 : vector<8x1xf32> to vector<8x1xf32>
    %28 = vector.broadcast %27 : vector<8x1xf32> to vector<8x600xf32>
    %29 = vector.broadcast %cst_4 : f32 to vector<8x600xf32>
    %30 = arith.select %26, %28, %29 : vector<8x600xi1>, vector<8x600xf32>
    %31 = arith.addf %18, %30 : vector<8x600xf32>
    %32 = vector.extract_strided_slice %3 {offsets = [0, 4], sizes = [8, 1], strides = [1, 1]} : vector<8x6xi32> to vector<8x1xi32>
    %33 = vector.extract_strided_slice %3 {offsets = [0, 5], sizes = [8, 1], strides = [1, 1]} : vector<8x6xi32> to vector<8x1xi32>
    %34 = vector.extract_strided_slice %1 {offsets = [0, 8], sizes = [8, 1], strides = [1, 1]} : vector<8x9xf32> to vector<8x1xf32>
    %35 = vector.broadcast %32 : vector<8x1xi32> to vector<8x600xi32>
    %36 = arith.cmpi sge, %4, %35 : vector<8x600xi32>
    %37 = vector.broadcast %33 : vector<8x1xi32> to vector<8x600xi32>
    %38 = arith.cmpi slt, %4, %37 : vector<8x600xi32>
    %39 = arith.andi %36, %38 : vector<8x600xi1>
    %cst_5 = arith.constant 0.000000e+00 : f32
    %40 = vector.shape_cast %34 : vector<8x1xf32> to vector<8x1xf32>
    %41 = vector.broadcast %40 : vector<8x1xf32> to vector<8x600xf32>
    %42 = vector.broadcast %cst_5 : f32 to vector<8x600xf32>
    %43 = arith.select %39, %41, %42 : vector<8x600xi1>, vector<8x600xf32>
    %44 = arith.addf %31, %43 : vector<8x600xf32>
    %cst_6 = arith.constant 0.000000e+00 : f32
    %45 = vector.broadcast %cst_6 : f32 to vector<8x600xf32>
    %46 = arith.cmpf ogt, %44, %45 : vector<8x600xf32>
    %cst_7 = arith.constant 0.000000e+00 : f32
    %47 = vector.broadcast %cst_7 : f32 to vector<8x600xf32>
    %48 = arith.select %46, %0, %47 : vector<8x600xi1>, vector<8x600xf32>
    %cst_8 = arith.constant 0.000000e+00 : f32
    %49 = vector.broadcast %cst_8 : f32 to vector<8x600xf32>
    %50 = arith.maximumf %48, %49 : vector<8x600xf32>
    %51 = math.absf %48 : vector<8x600xf32>
    %cst_9 = arith.constant 0.000000e+00 : f32
    %52 = vector.broadcast %cst_9 : f32 to vector<8x600xf32>
    %53 = arith.subf %52, %51 : vector<8x600xf32>
    %54 = math.exp %53 : vector<8x600xf32>
    %cst_10 = arith.constant 1.000000e+00 : f32
    %55 = vector.broadcast %cst_10 : f32 to vector<8x600xf32>
    %56 = arith.addf %55, %54 : vector<8x600xf32>
    %57 = math.log %56 : vector<8x600xf32>
    %58 = arith.addf %50, %57 : vector<8x600xf32>
    %59 = arith.mulf %58, %44 : vector<8x600xf32>
    %60 = vector.shape_cast %59 : vector<8x600xf32> to vector<1x8x600xf32>
    %cst_11 = arith.constant dense<0.000000e+00> : vector<1xf32>
    %61 = vector.multi_reduction <add>, %60, %cst_11 [1, 2] : vector<1x8x600xf32> to vector<1xf32>
    %62 = vector.shape_cast %61 : vector<1xf32> to vector<1x1x1xf32>
    %63 = vector.extract %62[0, 0, 0] : f32 from vector<1x1x1xf32>
    %64 = vector.broadcast %63 : f32 to vector<1x1xf32>
    %65 = vector.shape_cast %64 : vector<1x1xf32> to vector<1x1xf32>
    %66 = vector.broadcast %65 : vector<1x1xf32> to vector<8x128xf32>
    %c0_12 = arith.constant 0 : index
    %c0_13 = arith.constant 0 : index
    %67 = vector.load %arg3[%c0_12, %c0_13] : memref<8x128xf32, #tpu.memory_space<vmem>>, vector<8x128xf32>
    tpu.vector_store %arg3[%c0_12, %c0_13], %66 {strides = array<i32>} : memref<8x128xf32, #tpu.memory_space<vmem>>, vector<8x128xf32>,
    return
  }
  func.func @transform_0(%arg0: i32) -> (i32, i32) {
    %c0_i32 = arith.constant 0 : i32
    %c0_i32_0 = arith.constant 0 : i32
    return %arg0, %c0_i32 : i32, i32
  }
  func.func @transform_1(%arg0: i32) -> (i32, i32) {
    %c0_i32 = arith.constant 0 : i32
    %c0_i32_0 = arith.constant 0 : i32
    return %arg0, %c0_i32 : i32, i32
  }
  func.func @transform_2(%arg0: i32) -> (i32, i32) {
    %c0_i32 = arith.constant 0 : i32
    %c0_i32_0 = arith.constant 0 : i32
    return %arg0, %c0_i32 : i32, i32
  }
}

</mosaic_0001>

<bundles_post_ra>
// kernel: clean_cel.1
= control target key start
LH: loop header
LB: loop body
LE: loop exit
PB: predicated region body
PF: predicated region fallthrough
CT: control target
= control target key end

     0   :  { %v277_v0 = vmov 2   ;;  %v278_v1 = vmov 0   ;;  %v279_v5 = vmov 3   ;;  %v280_v6 = vmov 1   ;;  %s438_s1 = inlined_call_operand.vmem [shape: f32[8,9], index: 1, kind: input, shape index: {}]   ;;  %s439_s0 = inlined_call_operand.vmem [shape: f32[3,600], index: 0, kind: input, shape index: {}]   ;;  %s440_s2 = inlined_call_operand.vmem [shape: f32[8,128], index: 2, kind: output, shape index: {}]  }
   0x1   :  { %243 = vset.pattern.permute.xlu1 %v277_v0  ;;  %241 = vset.pattern.permute.xlu0 %v278_v1  ;;  %v17_v2 = vld [vmem:[%s438_s1] sm:$0xff]  ;;  %v281_v7 = vmov 6   ;;  %v282_v8 = vmov 7   ;;  %v283_v9 = vmov 4   ;;  %v284_v10 = vmov 8  }
   0x2   :  { %v228_v3 = vtrunc.f32 %v17_v2  ;;  %v285_v11 = vmov 5   ;;  %v19_v13 = vlaneseq  ;;  %v441_v23 = vmov 0  ;;  %v250_v49 = vld [vmem:[%s439_s0] ss:$20 sps:$4 sm:$0xff]   ;;  %v252_v53 = vld [vmem:[%s439_s0 + $0x4] ss:$20 sps:$4 sm:$0xff]  }
   0x3   :  { %v253_v57 = vld [vmem:[%s439_s0 + $0x8] ss:$20 sps:$4 sm:$0xff]   ;;  %v255_v62 = vld [vmem:[%s439_s0 + $0xc] ss:$20 sps:$4 sm:$0xff]  }
   0x4   :  { %v229_v4 = vcvt.f32.s32 %v228_v3  ;;  %v20_v15 = vand.u32 127, %v19_v13 }
   0x6   :  { %62 = vperm.xlu1 %243, %v229_v4   ;;  %26 = vperm.xlu0 %241, %v229_v4   ;;  %v21_v18 = vadd.s32 128, %v20_v15  ;;  %v22_v19 = vadd.s32 256, %v20_v15  ;;  %v306_v21 = vadd.s32 384, %v20_v15  ;;  %v308_v22 = vadd.s32 512, %v20_v15 }
   0xa   :  { %244 = vset.pattern.permute.xlu1 %v279_v5  ;;  %242 = vset.pattern.permute.xlu0 %v280_v6 }
   0xb   :  { %70 = vperm.xlu1 %244, %v229_v4   ;;  %34 = vperm.xlu0 %242, %v229_v4  }
   0xf   :  { %245 = vset.pattern.permute.xlu1 %v281_v7  ;;  %246 = vset.pattern.permute.xlu0 %v282_v8 }
  0x10   :  { %48 = vperm.xlu1 %245, %v17_v2   ;;  %83 = vperm.xlu0 %246, %v17_v2  }
  0x14   :  { %247 = vset.pattern.permute.xlu1 %v283_v9  ;;  %249 = vset.pattern.permute.xlu0 %v284_v10  ;;  %v256_v10 = vld [vmem:[%s439_s0 + $0x10] ss:$20 sps:$4 sm:$0xff]  }
  0x15   :  { %97 = vperm.xlu1 %247, %v229_v4   ;;  %118 = vperm.xlu0 %249, %v17_v2  }
  0x19   :  { %248 = vset.pattern.permute.xlu1 %v285_v11 }
  0x1a   :  { %105 = vperm.xlu1 %248, %v229_v4  }
  0x85   :  { %v63_v12 = vpop.permute.xlu1 %62  ;;  %v27_v14 = vpop.permute.xlu0 %26 }
  0x86   :  { %vm28_vm1 = vcmp.ge.s32.totalorder %v20_v15, %v27_v14  ;;  %vm64_vm3 = vcmp.ge.s32.totalorder %v20_v15, %v63_v12  ;;  %vm29_vm4 = vcmp.ge.s32.totalorder %v21_v18, %v27_v14  ;;  %vm30_vm6 = vcmp.ge.s32.totalorder %v22_v19, %v27_v14 }
  0x87   :  { %vm31_vm9 = vcmp.ge.s32.totalorder %v306_v21, %v27_v14  ;;  %vm32_vm12 = vcmp.ge.s32.totalorder %v308_v22, %v27_v14 }
  0x8a   :  { %v71_v16 = vpop.permute.xlu1 %70  ;;  %v35_v17 = vpop.permute.xlu0 %34 }
  0x8b   :  { %vm72_vm0 = vcmp.lt.s32.totalorder %v20_v15, %v71_v16  ;;  %vm36_vm2 = vcmp.lt.s32.totalorder %v20_v15, %v35_v17  ;;  %vm37_vm5 = vcmp.lt.s32.totalorder %v21_v18, %v35_v17  ;;  %vm38_vm7 = vcmp.lt.s32.totalorder %v22_v19, %v35_v17 }
  0x8c   :  { %vm310_vm8 = vmand %vm64_vm3, %vm72_vm0  ;;  %vm39_vm10 = vcmp.lt.s32.totalorder %v306_v21, %v35_v17  ;;  %vm40_vm13 = vcmp.lt.s32.totalorder %v308_v22, %v35_v17  ;;  %vm73_vm15 = vcmp.lt.s32.totalorder %v21_v18, %v71_v16  ;;  %vm65_vm3 = vcmp.ge.s32.totalorder %v21_v18, %v63_v12 }
  0x8d   :  { %v442_v23 = vsel %vm310_vm8, 4294967295, %v441_v23  ;;  %vm316_vm11 = vmand %vm28_vm1, %vm36_vm2  ;;  %vm74_vm1 = vcmp.lt.s32.totalorder %v22_v19, %v71_v16  ;;  %vm75_vm8 = vcmp.lt.s32.totalorder %v306_v21, %v71_v16 }
  0x8e   :  { %vm322_vm14 = vmand %vm29_vm4, %vm37_vm5  ;;  %vm453_vm5 = vnez %v442_v23 }
  0x8f   :  { %v304_v20 = vpop.permute.xlu1 %48  ;;  %v326_v26 = vpop.permute.xlu0 %83  ;;  %vm328_vm0 = vmand %vm30_vm6, %vm38_vm7  ;;  %vm66_vm6 = vcmp.ge.s32.totalorder %v22_v19, %v63_v12  ;;  %vm76_vm7 = vcmp.lt.s32.totalorder %v308_v22, %v71_v16 }
  0x90   :  { %vm332_vm2 = vmand %vm31_vm9, %vm39_vm10  ;;  %v51_v31 = vsel %vm316_vm11, %v304_v20, 0.0  ;;  %v86_v32 = vsel %vm453_vm5, %v326_v26, 0.0  ;;  %vm67_vm10 = vcmp.ge.s32.totalorder %v306_v21, %v63_v12  ;;  %v52_v34 = vsel %vm322_vm14, %v304_v20, 0.0 }
  0x91   :  { %vm337_vm4 = vmand %vm32_vm12, %vm40_vm13  ;;  %vm68_vm12 = vcmp.ge.s32.totalorder %v308_v22, %v63_v12  ;;  %v53_v35 = vsel %vm328_vm0, %v304_v20, 0.0  ;;  %v54_v37 = vsel %vm332_vm2, %v304_v20, 0.0  ;;  %v91_v42 = vadd.f32 %v86_v32, %v51_v31 }
  0x92   :  { %vm348_vm9 = vmand %vm65_vm3, %vm73_vm15  ;;  %v55_v45 = vsel %vm337_vm4, %v304_v20, 0.0 }
  0x93   :  { %vm360_vm11 = vmand %vm66_vm6, %vm74_vm1  ;;  %v87_v39 = vsel %vm348_vm9, %v326_v26, 0.0 }
  0x94   :  { %v98_v28 = vpop.permute.xlu1 %97  ;;  %vm367_vm13 = vmand %vm67_vm10, %vm75_vm8  ;;  %v88_v40 = vsel %vm360_vm11, %v326_v26, 0.0  ;;  %v119_v43 = vpop.permute.xlu0 %118  ;;  %v92_v47 = vadd.f32 %v87_v39, %v52_v34 }
  0x95   :  { %vm377_vm14 = vmand %vm68_vm12, %vm76_vm7  ;;  %vm99_vm15 = vcmp.ge.s32.totalorder %v20_v15, %v98_v28  ;;  %v89_v46 = vsel %vm367_vm13, %v326_v26, 0.0  ;;  %vm100_vm2 = vcmp.ge.s32.totalorder %v21_v18, %v98_v28  ;;  %vm101_vm6 = vcmp.ge.s32.totalorder %v22_v19, %v98_v28 }
  0x96   :  { %v93_v50 = vadd.f32 %v88_v40, %v53_v35  ;;  %vm102_vm4 = vcmp.ge.s32.totalorder %v306_v21, %v98_v28  ;;  %v94_v54 = vadd.f32 %v89_v46, %v54_v37  ;;  %vm103_vm12 = vcmp.ge.s32.totalorder %v308_v22, %v98_v28 }
  0x97   :  { %v90_v58 = vsel %vm377_vm14, %v326_v26, 0.0 }
  0x98   :  { %v95_v6 = vadd.f32 %v90_v58, %v55_v45 }
  0x99   :  { %v106_v41 = vpop.permute.xlu1 %105 }
  0x9a   :  { %vm107_vm8 = vcmp.lt.s32.totalorder %v20_v15, %v106_v41  ;;  %vm108_vm0 = vcmp.lt.s32.totalorder %v21_v18, %v106_v41  ;;  %vm109_vm1 = vcmp.lt.s32.totalorder %v22_v19, %v106_v41  ;;  %vm110_vm3 = vcmp.lt.s32.totalorder %v306_v21, %v106_v41 }
  0x9b   :  { %vm112_vm5 = vmand %vm99_vm15, %vm107_vm8  ;;  %vm111_vm7 = vcmp.lt.s32.totalorder %v308_v22, %v106_v41 }
  0x9c   :  { %vm113_vm9 = vmand %vm100_vm2, %vm108_vm0  ;;  %v121_v48 = vsel %vm112_vm5, %v119_v43, 0.0  ;;  %vm210_vm2 = vcmask 719872  }
  0x9d   :  { %vm114_vm10 = vmand %vm101_vm6, %vm109_vm1  ;;  %v122_v51 = vsel %vm113_vm9, %v119_v43, 0.0  ;;  %v393_v52 = vadd.f32 %v121_v48, %v91_v42 }
  0x9e   :  { %vm115_vm11 = vmand %vm102_vm4, %vm110_vm3  ;;  %v123_v55 = vsel %vm114_vm10, %v119_v43, 0.0  ;;  %v401_v56 = vadd.f32 %v122_v51, %v92_v47 }
  0x9f   :  { %vm411_vm13 = vmand %vm103_vm12, %vm111_vm7  ;;  %v124_v60 = vsel %vm115_vm11, %v119_v43, 0.0  ;;  %v415_v61 = vadd.f32 %v123_v55, %v93_v50  ;;  %vm131_vm15 = vcmp.gt.f32.partialorder %v393_v52, 0.0 }
  0xa0   :  { %v421_v63 = vadd.f32 %v124_v60, %v94_v54  ;;  %vm132_vm8 = vcmp.gt.f32.partialorder %v401_v56, 0.0  ;;  %v152_v0 = vsel %vm131_vm15, %v250_v49, 0.0  ;;  %v125_v1 = vsel %vm411_vm13, %v119_v43, 0.0 }
  0xa1   :  { %vm133_vm14 = vcmp.gt.f32.partialorder %v415_v61, 0.0  ;;  %v153_v2 = vsel %vm132_vm8, %v252_v53, 0.0  ;;  %v162_v3 = vand.u32 2147483647, %v152_v0  ;;  %v130_v13 = vadd.f32 %v125_v1, %v95_v6 }
  0xa2   :  { %vm134_vm0 = vcmp.gt.f32.partialorder %v421_v63, 0.0  ;;  %v154_v4 = vsel %vm133_vm14, %v253_v57, 0.0  ;;  %v163_v5 = vand.u32 2147483647, %v153_v2  ;;  %v157_v36 = vmax.f32 %v152_v0, 0.0 }
  0xa3   :  { %v155_v7 = vsel %vm134_vm0, %v255_v62, 0.0  ;;  %v164_v8 = vand.u32 2147483647, %v154_v4  ;;  %v167_v9 = vsub.f32 0.0, %v162_v3  ;;  %vm135_vm1 = vcmp.gt.f32.partialorder %v130_v13, 0.0 }
  0xa4   :  { %v165_v11 = vand.u32 2147483647, %v155_v7  ;;  %v168_v12 = vsub.f32 0.0, %v163_v5  ;;  %v156_v19 = vsel %vm135_vm1, %v256_v10, 0.0  ;;  %v158_v39 = vmax.f32 %v153_v2, 0.0 }
  0xa5   :  { %v169_v14 = vsub.f32 0.0, %v164_v8  ;;  %v172_v15 = vmul.f32 1.442695, %v167_v9  ;;  %v166_v21 = vand.u32 2147483647, %v156_v19  ;;  %v159_v42 = vmax.f32 %v154_v4, 0.0 }
  0xa6   :  { %v170_v16 = vsub.f32 0.0, %v165_v11  ;;  %v174_v17 = vmul.f32 1.442695, %v168_v12  ;;  %v160_v46 = vmax.f32 %v155_v7, 0.0  ;;  %v161_v54 = vmax.f32 %v156_v19, 0.0 }
  0xa7   :  { %257 = vpow2.f32 %v172_v15  ;;  %v176_v18 = vmul.f32 1.442695, %v169_v14  ;;  %v171_v22 = vsub.f32 0.0, %v166_v21 }
  0xa8   :  { %259 = vpow2.f32 %v174_v17  ;;  %v178_v20 = vmul.f32 1.442695, %v170_v16 }
  0xa9   :  { %261 = vpow2.f32 %v176_v18  ;;  %v180_v23 = vmul.f32 1.442695, %v171_v22 }
  0xaa   :  { %263 = vpow2.f32 %v178_v20 }
  0xab   :  { %265 = vpow2.f32 %v180_v23 }
  0xb1   :  { %v258_v24 = vpop.eup %257 }
  0xb2   :  { %v260_v25 = vpop.eup %259  ;;  %v182_v26 = vadd.f32 1.0, %v258_v24 }
  0xb3   :  { %v262_v27 = vpop.eup %261  ;;  %v183_v28 = vadd.f32 1.0, %v260_v25 }
  0xb4   :  { %v264_v29 = vpop.eup %263  ;;  %267 = vlog2.f32 %v182_v26  ;;  %v184_v30 = vadd.f32 1.0, %v262_v27 }
  0xb5   :  { %269 = vlog2.f32 %v183_v28  ;;  %v185_v31 = vadd.f32 1.0, %v264_v29  ;;  %v266_v32 = vpop.eup %265 }
  0xb6   :  { %271 = vlog2.f32 %v184_v30  ;;  %v186_v33 = vadd.f32 1.0, %v266_v32 }
  0xb7   :  { %273 = vlog2.f32 %v185_v31 }
  0xb8   :  { %275 = vlog2.f32 %v186_v33 }
  0xbe   :  { %v268_v34 = vpop.eup %267 }
  0xbf   :  { %v270_v35 = vpop.eup %269  ;;  %v188_v37 = vmul.f32 0.6931472, %v268_v34 }
  0xc0   :  { %v272_v38 = vpop.eup %271  ;;  %v190_v40 = vmul.f32 0.6931472, %v270_v35 }
  0xc1   :  { %v274_v41 = vpop.eup %273  ;;  %v197_v43 = vadd.f32 %v188_v37, %v157_v36  ;;  %v192_v44 = vmul.f32 0.6931472, %v272_v38 }
  0xc2   :  { %v198_v45 = vadd.f32 %v190_v40, %v158_v39  ;;  %v194_v47 = vmul.f32 0.6931472, %v274_v41  ;;  %v276_v53 = vpop.eup %275 }
  0xc3   :  { %v202_v48 = vmul.f32 %v197_v43, %v393_v52  ;;  %v199_v49 = vadd.f32 %v192_v44, %v159_v42  ;;  %v196_v55 = vmul.f32 0.6931472, %v276_v53 }
  0xc4   :  { %v203_v50 = vmul.f32 %v198_v45, %v401_v56  ;;  %v200_v51 = vadd.f32 %v194_v47, %v160_v46 }
  0xc5   :  { %v204_v57 = vmul.f32 %v199_v49, %v415_v61  ;;  %v201_v59 = vadd.f32 %v196_v55, %v161_v54 }
  0xc6   :  { %v207_v58 = vadd.f32 %v203_v50, %v202_v48  ;;  %v205_v60 = vmul.f32 %v200_v51, %v421_v63 }
  0xc7   :  { %v206_v0 = vmul.f32 %v201_v59, %v130_v13 }
  0xc8   :  { %v208_v62 = vadd.f32 %v207_v58, %v204_v57 }
  0xc9   :  { %v211_v2 = vsel %vm210_vm2, %v206_v0, 0.0 }
  0xca   :  { %v209_v1 = vadd.f32 %v208_v62, %v205_v60 }
  0xcc   :  { %v212_v3 = vadd.f32 %v211_v2, %v209_v1 }
  0xce   :  { %213 = vadd.xlane.f32.xlu1 %v212_v3 }
 0x15b   :  { %v214_v52 = vpop.xlane.xlu1 %213 }
 0x15c   :  { %v215_v4 = vrot.slane %v214_v52, 4 }
 0x15e   :  { %v216_v56 = vadd.f32 %v215_v4, %v214_v52 }
 0x160   :  { %v217_v5 = vrot.slane %v216_v56, 2 }
 0x162   :  { %v218_v6 = vadd.f32 %v217_v5, %v216_v56 }
 0x164   :  { %v219_v7 = vrot.slane %v218_v6, 1 }
 0x166   :  { %v220_v8 = vadd.f32 %v219_v7, %v218_v6 }
 0x168   :  { %230 = vpush %v220_v8 }
 0x199   :  { %s231_s0 = spop %230 }
 0x19a   :  { %v222_v61 = vstv %s231_s0 }
 0x19b   :  { %223 = vst [vmem:[%s440_s2] sm:$0xff] %v222_v61 }

</bundles_post_ra>
